<compile_context>
chip_gen: v6e
topology: v6e:2x2x1
jax: 0.10.0
libtpu: 0.0.40
codegen_flags: <defaults>
</compile_context>

<pallas_src>
import functools

import jax
import jax.numpy as jnp
from jax import lax
from jax.experimental import pallas as pl
from jax.experimental.pallas import tpu as pltpu

MARGIN = 2.0
EPS = 1e-6                      # torch.nn.functional.pairwise_distance default eps
_NUM_CORES = 2                  # leading 'parallel' axis (2 TCs on v7x; cheap loop elsewhere)
_LANE = 128
_FOOTPRINT_BUDGET = 20 * 1024 * 1024   # target total pipeline VMEM (all buffers)
_VMEM_LIMIT_CAP = 48 * 1024 * 1024     # explicit scoped-VMEM limit (< v7x 64 MiB physical)


def _round_up(x, m):
    return ((x + m - 1) // m) * m


def _contrastive_loss_kernel(n_ref, o1_ref, o2_ref, lbl_ref, out_ref, *,
                             margin, tile_n):
    c = pl.program_id(0)            # core / row-range split (parallel)
    i = pl.program_id(1)            # tile index within the core's range

    # Per-core accumulator lives in the resident lane-dense (1, tile_n) block.
    @pl.when(i == 0)
    def _init():
        out_ref[...] = jnp.zeros_like(out_ref)

    # (D, tile_n) slabs, cast to f32 on the VMEM tile (bf16 inputs accepted).
    # torch: pairwise_distance adds eps to (x1 - x2) before the 2-norm.
    diff = (o1_ref[...].astype(jnp.float32)
            - o2_ref[...].astype(jnp.float32) + EPS)
    d2 = jnp.sum(diff * diff, axis=0, keepdims=True)         # (1, tile_n) lane-dense
    d = jnp.sqrt(d2)                                          # lane-dense EUP
    lbl = lbl_ref[...]                                        # (1, tile_n)

    # Positive branch uses d2 directly (avoids sqrt->square round trip).
    per_row = (1.0 - lbl) * d2 + lbl * jnp.square(jnp.maximum(margin - d, 0.0))

    tile_idx = c * pl.num_programs(1) + i
    n_valid = n_ref[0]
    # Only tiles whose row range extends past n_valid can contain padded rows.
    may_pad = (tile_idx + 1) * tile_n > n_valid

    @pl.when(jnp.logical_not(may_pad))
    def _acc():
        out_ref[...] += per_row                               # pure VPU adds

    @pl.when(may_pad)
    def _acc_masked():
        col = (lax.broadcasted_iota(jnp.int32, per_row.shape, 1)
               + tile_idx * tile_n)
        out_ref[...] += jnp.where(col < n_valid, per_row, 0.0)


def contrastive_loss(output1, output2, label, margin=MARGIN):
    """output1/output2: (N, D) embeddings (f32 or bf16); label: (N, 1) or (N,)."""
    output1 = jnp.asarray(output1)
    output2 = jnp.asarray(output2)
    if not jnp.issubdtype(output1.dtype, jnp.floating):
        output1 = output1.astype(jnp.float32)
    if output2.dtype != output1.dtype:
        output2 = output2.astype(output1.dtype)
    label = jnp.asarray(label, jnp.float32).reshape(1, -1)    # lane-dense labels

    n, d = output1.shape
    itemsize = output1.dtype.itemsize

    # --- Tile sizing against the true (padded) VMEM footprint -----------------
    # Embedding block (D, tile_n): sublane dim pads to the dtype packing.
    sub_pack = max(8, 32 // itemsize)                 # 8 (f32) / 16 (bf16) / 32 (i8)
    d_pad = _round_up(d, sub_pack)
    in_bytes_per_lane = d_pad * itemsize              # one input block, per lane column
    lbl_bytes_per_lane = 8 * 4                        # (1, tile_n) f32 pads to 8 sublanes
    out_bytes_per_lane = 8 * 4
    per_lane = (2 * 2 * in_bytes_per_lane             # 2 inputs x double buffer
                + 2 * lbl_bytes_per_lane              # labels, double buffered
                + 2 * out_bytes_per_lane)             # resident accumulator (headroom)
    cap = max(_LANE, (_FOOTPRINT_BUDGET // per_lane) // _LANE * _LANE)
    rows_per_core = _round_up(pl.cdiv(n, _NUM_CORES), _LANE)
    tile_n = min(cap, rows_per_core)
    tiles_per_core = pl.cdiv(n, tile_n * _NUM_CORES)
    padded_n = tiles_per_core * tile_n * _NUM_CORES
    vmem_limit = int(min(_VMEM_LIMIT_CAP, per_lane * tile_n + (8 << 20)))

    # --- Layout plumbing: rows -> lanes ---------------------------------------
    # Callers that can already supply (D, N) embeddings would skip this pass.
    o1_t = output1.T                                   # (D, N)
    o2_t = output2.T
    if padded_n != n:
        pad = padded_n - n
        o1_t = jnp.pad(o1_t, ((0, 0), (0, pad)))
        o2_t = jnp.pad(o2_t, ((0, 0), (0, pad)))
        label = jnp.pad(label, ((0, 0), (0, pad)))

    kernel = functools.partial(_contrastive_loss_kernel,
                               margin=float(margin), tile_n=tile_n)

    def in_map(c, i, n_ref):                           # prefetch ref is positional
        return (0, c * tiles_per_core + i)

    partials = pl.pallas_call(
        kernel,
        out_shape=jax.ShapeDtypeStruct((1, _NUM_CORES * tile_n), jnp.float32),
        grid_spec=pltpu.PrefetchScalarGridSpec(
            num_scalar_prefetch=1,
            grid=(_NUM_CORES, tiles_per_core),
            in_specs=[
                pl.BlockSpec((d, tile_n), in_map),
                pl.BlockSpec((d, tile_n), in_map),
                pl.BlockSpec((1, tile_n), in_map),
            ],
            out_specs=pl.BlockSpec((1, tile_n), lambda c, i, n_ref: (0, c)),
        ),
        compiler_params=pltpu.CompilerParams(
            dimension_semantics=("parallel", "arbitrary"),
            vmem_limit_bytes=vmem_limit,
        ),
    )(jnp.array([n], dtype=jnp.int32), o1_t, o2_t, label)

    # Single cross-lane reduction happens once, outside the hot loop.
    return jnp.sum(partials) / jnp.float32(n)


def contrastive_loss_ref(output1, output2, label, margin=MARGIN):
    """Pure-JAX reference mirroring the PyTorch forward exactly (sqrt then square)."""
    output1 = jnp.asarray(output1, jnp.float32)
    output2 = jnp.asarray(output2, jnp.float32)
    label = jnp.asarray(label, jnp.float32).reshape(-1, 1)
    dist = jnp.sqrt(jnp.sum(jnp.square(output1 - output2 + EPS), axis=-1, keepdims=True))
    return jnp.mean((1.0 - label) * dist ** 2
                    + label * jnp.clip(margin - dist, 0.0) ** 2)


if __name__ == "__main__":
    key = jax.random.PRNGKey(0)

    # Small shape consistent with a Siamese-net embedding pair.
    k1, k2, k3 = jax.random.split(key, 3)
    N, D = 8, 32
    o1 = jax.random.normal(k1, (N, D), dtype=jnp.float32)
    o2 = jax.random.normal(k2, (N, D), dtype=jnp.float32)
    lbl = jax.random.bernoulli(k3, 0.5, (N, 1)).astype(jnp.float32)

    loss = contrastive_loss(o1, o2, lbl)
    jax.block_until_ready(loss)
    ref = contrastive_loss_ref(o1, o2, lbl)
    assert jnp.allclose(loss, ref, rtol=1e-5, atol=1e-5), (loss, ref)

    # Second check: batch not a multiple of the tiling (exercises masking /
    # the two-core row split / padded tail).
    k4, k5, k6 = jax.random.split(jax.random.PRNGKey(1), 3)
    N2, D2 = 300, 32
    o1b = jax.random.normal(k4, (N2, D2), dtype=jnp.float32)
    o2b = jax.random.normal(k5, (N2, D2), dtype=jnp.float32)
    lblb = jax.random.bernoulli(k6, 0.5, (N2, 1)).astype(jnp.float32)

    loss2 = contrastive_loss(o1b, o2b, lblb)
    jax.block_until_ready(loss2)
    ref2 = contrastive_loss_ref(o1b, o2b, lblb)
    assert jnp.allclose(loss2, ref2, rtol=1e-5, atol=1e-5), (loss2, ref2)

    # Third check: bf16 inputs take the cast-on-tile path.
    loss3 = contrastive_loss(o1b.astype(jnp.bfloat16), o2b.astype(jnp.bfloat16), lblb)
    jax.block_until_ready(loss3)
    ref3 = contrastive_loss_ref(o1b.astype(jnp.bfloat16).astype(jnp.float32),
                                o2b.astype(jnp.bfloat16).astype(jnp.float32), lblb)
    assert jnp.allclose(loss3, ref3, rtol=1e-3, atol=1e-3), (loss3, ref3)

    print("KERNEL_OK")
</pallas_src>

<mosaic_0001>
module attributes {stable_mosaic.version = 11 : i64} {
  func.func @_contrastive_loss_kernel(%arg0: i32, %arg1: i32, %arg2: memref<1xi32, #tpu.memory_space<smem>>, %arg3: memref<32x128xf32, #tpu.memory_space<vmem>>, %arg4: memref<32x128xf32, #tpu.memory_space<vmem>>, %arg5: memref<1x128xf32, #tpu.memory_space<vmem>>, %arg6: memref<1x128xf32, #tpu.memory_space<vmem>>) attributes {dimension_semantics = [#tpu.dimension_semantics<parallel>, #tpu.dimension_semantics<arbitrary>], iteration_bounds = array<i64: 2, 1>, scalar_prefetch = 1 : i64, scratch_operands = 0 : i64, tpu.core_type = #tpu.core_type<tc>, window_params = [{transform_indices = @transform_0, window_bounds = array<i64: 32, 128>}, {transform_indices = @transform_1, window_bounds = array<i64: 32, 128>}, {transform_indices = @transform_2, window_bounds = array<i64: 1, 128>}, {transform_indices = @transform_3, window_bounds = array<i64: 1, 128>}]} {
    %c0_i32 = arith.constant 0 : i32
    %0 = arith.cmpi eq, %arg1, %c0_i32 : i32
    %1 = arith.extui %0 : i1 to i32
    %c0_i32_0 = arith.constant 0 : i32
    %2 = arith.cmpi ne, %1, %c0_i32_0 : i32
    scf.if %2 {
      %cst_14 = arith.constant 0.000000e+00 : f32
      %34 = vector.broadcast %cst_14 : f32 to vector<1x128xf32>
      %c0_15 = arith.constant 0 : index
      %c0_16 = arith.constant 0 : index
      %35 = vector.load %arg6[%c0_15, %c0_16] : memref<1x128xf32, #tpu.memory_space<vmem>>, vector<1x128xf32>
      tpu.vector_store %arg6[%c0_15, %c0_16], %34 {strides = array<i32>} : memref<1x128xf32, #tpu.memory_space<vmem>>, vector<1x128xf32>,
    } else {
    }
    %c0 = arith.constant 0 : index
    %c0_1 = arith.constant 0 : index
    %3 = vector.load %arg3[%c0, %c0_1] : memref<32x128xf32, #tpu.memory_space<vmem>>, vector<32x128xf32>
    %c0_2 = arith.constant 0 : index
    %c0_3 = arith.constant 0 : index
    %4 = vector.load %arg4[%c0_2, %c0_3] : memref<32x128xf32, #tpu.memory_space<vmem>>, vector<32x128xf32>
    %5 = arith.subf %3, %4 : vector<32x128xf32>
    %cst = arith.constant 9.99999997E-7 : f32
    %6 = vector.broadcast %cst : f32 to vector<32x128xf32>
    %7 = arith.addf %5, %6 : vector<32x128xf32>
    %8 = arith.mulf %7, %7 : vector<32x128xf32>
    %cst_4 = arith.constant dense<0.000000e+00> : vector<128xf32>
    %9 = vector.multi_reduction <add>, %8, %cst_4 [0] : vector<32x128xf32> to vector<128xf32>
    %10 = vector.shape_cast %9 : vector<128xf32> to vector<1x128xf32>
    %11 = math.sqrt %10 : vector<1x128xf32>
    %c0_5 = arith.constant 0 : index
    %c0_6 = arith.constant 0 : index
    %12 = vector.load %arg5[%c0_5, %c0_6] : memref<1x128xf32, #tpu.memory_space<vmem>>, vector<1x128xf32>
    %cst_7 = arith.constant 1.000000e+00 : f32
    %13 = vector.broadcast %cst_7 : f32 to vector<1x128xf32>
    %14 = arith.subf %13, %12 : vector<1x128xf32>
    %15 = arith.mulf %14, %10 : vector<1x128xf32>
    %cst_8 = arith.constant 2.000000e+00 : f32
    %16 = vector.broadcast %cst_8 : f32 to vector<1x128xf32>
    %17 = arith.subf %16, %11 : vector<1x128xf32>
    %cst_9 = arith.constant 0.000000e+00 : f32
    %18 = vector.broadcast %cst_9 : f32 to vector<1x128xf32>
    %19 = arith.maximumf %17, %18 : vector<1x128xf32>
    %20 = arith.mulf %19, %19 : vector<1x128xf32>
    %21 = arith.mulf %12, %20 : vector<1x128xf32>
    %22 = arith.addf %15, %21 : vector<1x128xf32>
    %c1_i32 = arith.constant 1 : i32
    %23 = arith.muli %arg0, %c1_i32 : i32
    %24 = arith.addi %23, %arg1 : i32
    %c0_10 = arith.constant 0 : index
    %25 = memref.load %arg2[%c0_10] : memref<1xi32, #tpu.memory_space<smem>>
    %c1_i32_11 = arith.constant 1 : i32
    %26 = arith.addi %24, %c1_i32_11 : i32
    %c128_i32 = arith.constant 128 : i32
    %27 = arith.muli %26, %c128_i32 : i32
    %28 = arith.cmpi sgt, %27, %25 : i32
    %true = arith.constant true
    %29 = arith.xori %28, %true : i1
    %30 = arith.extui %29 : i1 to i32
    %c0_i32_12 = arith.constant 0 : i32
    %31 = arith.cmpi ne, %30, %c0_i32_12 : i32
    scf.if %31 {
      %c0_14 = arith.constant 0 : index
      %c0_15 = arith.constant 0 : index
      %34 = vector.load %arg6[%c0_14, %c0_15] : memref<1x128xf32, #tpu.memory_space<vmem>>, vector<1x128xf32>
      %35 = arith.addf %34, %22 : vector<1x128xf32>
      %c0_16 = arith.constant 0 : index
      %c0_17 = arith.constant 0 : index
      %36 = vector.load %arg6[%c0_16, %c0_17] : memref<1x128xf32, #tpu.memory_space<vmem>>, vector<1x128xf32>
      tpu.vector_store %arg6[%c0_16, %c0_17], %35 {strides = array<i32>} : memref<1x128xf32, #tpu.memory_space<vmem>>, vector<1x128xf32>,
    } else {
    }
    %32 = arith.extui %28 : i1 to i32
    %c0_i32_13 = arith.constant 0 : i32
    %33 = arith.cmpi ne, %32, %c0_i32_13 : i32
    scf.if %33 {
      %34 = tpu.iota {dimensions = array<i32: 1>} : vector<1x128xi32>
      %c128_i32_14 = arith.constant 128 : i32
      %35 = arith.muli %24, %c128_i32_14 : i32
      %36 = vector.broadcast %35 : i32 to vector<1x128xi32>
      %37 = arith.addi %34, %36 : vector<1x128xi32>
      %c0_15 = arith.constant 0 : index
      %c0_16 = arith.constant 0 : index
      %38 = vector.load %arg6[%c0_15, %c0_16] : memref<1x128xf32, #tpu.memory_space<vmem>>, vector<1x128xf32>
      %39 = vector.broadcast %25 : i32 to vector<1x128xi32>
      %40 = arith.cmpi slt, %37, %39 : vector<1x128xi32>
      %cst_17 = arith.constant 0.000000e+00 : f32
      %41 = vector.broadcast %cst_17 : f32 to vector<1x128xf32>
      %42 = arith.select %40, %22, %41 : vector<1x128xi1>, vector<1x128xf32>
      %43 = arith.addf %38, %42 : vector<1x128xf32>
      %c0_18 = arith.constant 0 : index
      %c0_19 = arith.constant 0 : index
      %44 = vector.load %arg6[%c0_18, %c0_19] : memref<1x128xf32, #tpu.memory_space<vmem>>, vector<1x128xf32>
      tpu.vector_store %arg6[%c0_18, %c0_19], %43 {strides = array<i32>} : memref<1x128xf32, #tpu.memory_space<vmem>>, vector<1x128xf32>,
    } else {
    }
    return
  }
  func.func @transform_0(%arg0: i32, %arg1: i32, %arg2: memref<1xi32, #tpu.memory_space<smem>>) -> (i32, i32) {
    %c1_i32 = arith.constant 1 : i32
    %0 = arith.muli %arg0, %c1_i32 : i32
    %1 = arith.addi %0, %arg1 : i32
    %c0_i32 = arith.constant 0 : i32
    %c0_i32_0 = arith.constant 0 : i32
    return %c0_i32, %1 : i32, i32
  }
  func.func @transform_1(%arg0: i32, %arg1: i32, %arg2: memref<1xi32, #tpu.memory_space<smem>>) -> (i32, i32) {
    %c1_i32 = arith.constant 1 : i32
    %0 = arith.muli %arg0, %c1_i32 : i32
    %1 = arith.addi %0, %arg1 : i32
    %c0_i32 = arith.constant 0 : i32
    %c0_i32_0 = arith.constant 0 : i32
    return %c0_i32, %1 : i32, i32
  }
  func.func @transform_2(%arg0: i32, %arg1: i32, %arg2: memref<1xi32, #tpu.memory_space<smem>>) -> (i32, i32) {
    %c1_i32 = arith.constant 1 : i32
    %0 = arith.muli %arg0, %c1_i32 : i32
    %1 = arith.addi %0, %arg1 : i32
    %c0_i32 = arith.constant 0 : i32
    %c0_i32_0 = arith.constant 0 : i32
    return %c0_i32, %1 : i32, i32
  }
  func.func @transform_3(%arg0: i32, %arg1: i32, %arg2: memref<1xi32, #tpu.memory_space<smem>>) -> (i32, i32) {
    %c0_i32 = arith.constant 0 : i32
    %c0_i32_0 = arith.constant 0 : i32
    return %c0_i32, %arg0 : i32, i32
  }
}

</mosaic_0001>

<bundles_post_ra>
// kernel: tpu_custom_call.1
= control target key start
LH: loop header
LB: loop body
LE: loop exit
PB: predicated region body
PF: predicated region fallthrough
CT: control target
= control target key end

     0   :  { %s930_s0 = inlined_call_operand.<no memory space> [shape: s32[1], index: 0, kind: input, shape index: {}]   ;;  %s931_s1 = inlined_call_operand.hbm [shape: f32[32,256], index: 1, kind: input, shape index: {}]   ;;  %s932_s2 = inlined_call_operand.hbm [shape: f32[32,256], index: 2, kind: input, shape index: {}]   ;;  %s933_s3 = inlined_call_operand.vmem [shape: f32[1,256], index: 3, kind: input, shape index: {}]   ;;  %s934_s4 = inlined_call_operand.hbm [shape: f32[1,256], index: 4, kind: output, shape index: {}]  }
   0x1   :  { %936 = sst [smem:[#allocation14_spill]] %s931_s1 }
   0x2   :  { %9 = sst [smem:[#allocation3]] %s930_s0 }
   0x3   :  { %10 = vsyncpa [#allocation5], 0 }
   0x4   :  { %12 = vsyncpa [#allocation5 + $0x1], 0 }
   0x5   :  { %13 = vsyncpa [#allocation8], 0 }
   0x6   :  { %15 = vsyncpa [#allocation8 + $0x1], 0 }
   0x7   :  { %16 = vsyncpa [#allocation6], 0 }
   0x8   :  { %18 = vsyncpa [#allocation6 + $0x1], 0  ;;  %s735_s17 = smov 0   ;;  %s737_s18 = smov 0  }
   0x9   :  { %s739_s19 = smov 0   ;;  %s741_s20 = smov 0  }
   0xa   :  { %s743_s21 = smov 0   ;;  %s745_s22 = smov 0  }
   0xb LB: > { %s465_s0 = sadd.s32 4294967295, %s698_s22   ;;  %s466_s23 = sadd.s32 4294967294, %s698_s22   ;;  %s698_s22 = sphi %s745_s22, %s24_s22   ;;  %s694_s21 = sphi %s743_s21, %s951_s21   ;;  %s690_s20 = sphi %s741_s20, %s950_s20   ;;  %s686_s19 = sphi %s739_s19, %s949_s19   ;;  %s682_s18 = sphi %s737_s18, %s948_s18   ;;  %s678_s17 = sphi %s735_s17, %s947_s17  }
   0xc   : > { %s36_s24 = sadd.s32 1, %s694_s21  ;;  %s45_s25 = sadd.s32 1, %s686_s19 }
   0xd   : > { %p38_p0 = scmp.ge.s32.totalorder %s36_s24, 2  ;;  %p52_p1 = scmp.ne.s32.totalorder %s686_s19, %s682_s18 }
   0xe   : > { %p53_p2 = scmp.eq.s32.totalorder %s698_s22, 0  ;;  %p58_p3 = scmp.ne.s32.totalorder %s682_s18, %s678_s17 }
   0xf   : > { %s953_s24 = smov (%p38_p0, %s36_s24), 0  ;;  %p59_p5 = scmp.eq.s32.totalorder %s465_s0, 0 }
  0x10   : > { %937 = sst [smem:[#allocation13_spill]] %s953_s24  ;;  %p776_p4 = por %p53_p2, %p52_p1 }
  0x11   : > { %s42_s27 = ssub.s32 %s694_s21, %s953_s24  ;;  %p138_p6 = scmp.eq.s32.totalorder %s465_s0, 1 }
  0x12   : > { %p43_p7 = scmp.eq.s32.totalorder %s42_s27, 0  ;;  %p782_p8 = por %p59_p5, %p58_p3 }
  0x13   : > { %p786_p9 = por %p138_p6, %p52_p1  ;;  %p144_p10 = scmp.eq.s32.totalorder %s466_s23, 1 }
  0x14   : > { %s791_s30 = scalar_select %p43_p7, %s686_s19, %s45_s25  }
  0x15   : > { %p793_p11 = por %p144_p10, %p58_p3  ;;  %p502_p13 = scmp.lt.s32.totalorder %s698_s22, 2 }
  0x16   : > { %s800_s6 = sand.u32 1, %s686_s19   ;;  %s470_s8 = sshll.u32 %s694_s21, 7 }
  0x17   : > { %s469_s7 = sshll.u32 %s800_s6, 5  ;;  %s942_s1 = sld [smem:[#allocation14_spill]] }
  0x18   : > { %s168_s12 = scalar_lea.vmem [#allocation4], %s469_s7  ;;  %p813_p0 = pnand %p502_p13, %p776_p4 }
  0x19   : > { %s175_s13 = sshll.u32 %s168_s12, 4  ;;  %s165_s15 = scalar_lea.sflag [#allocation5], %s800_s6  ;;  %s176_s13 = int_to_ptr.vmem [resolvable:$true] %s175_s13 }
  0x1a   : > { %p560_p1 = pneg %p813_p0  ;;  %s571_s16 = scalar_lea.vmem %s176_s13, 512 }
  0x1b   : > { %p572_p2 = scmp.ne.s32.totalorder %s176_s13, %s571_s16  ;;  %s700_s0 = smov [#allocation4]  }
  0x1c   : > { %s576_s23 = sshll.u32 %s700_s0, 4  ;;  %s577_s23 = int_to_ptr.vmem [resolvable:$false] %s576_s23 }
  0x1d   : > { %s174_s11 = scalar_lea.hbm %s942_s1, %s470_s8  ;;  %p574_p3 = pnand %p572_p2, %p560_p1 }
  0x1e   : > { %s578_s25 = scalar_lea.vmem %s577_s23, 1024  ;;  %p579_p6 = scmp.lt.s32.totalorder %s176_s13, %s577_s23 }
  0x1f   : > { %p575_p5 = pneg %p574_p3  ;;  %p580_p4 = scmp.lt.s32.totalorder %s578_s25, %s571_s16 }
  0x21   : > { %p581_p7 = por %p580_p4, %p579_p6 }
  0x23   : > { %p582_p10 = pnand %p581_p7, %p575_p5 }
  0x25   : > { %585 = shalt.err (!%p582_p10)
}
  0x26   : > { %s701_s26 = smov 256   ;;  %s702_s27 = smov 128  }
  0x27   : > { %s703_s9 = smov 8   ;;  %p473_p13 = scmp.ge.s32.totalorder %s698_s22, 1 }
  0x28   : > { %494 = dma.hbm_to_vmem [thread:$0]  (!%p813_p0), %s174_s11, 512, %s176_s13, %s165_s15, %s701_s26, %s702_s27, %s703_s9  }
  0x29   : > { %p212_p2 = scmp.lt.s32.totalorder %s698_s22, 3  ;;  %s195_s0 = scalar_lea.hbm %s932_s2, %s470_s8 }
  0x2a   : > { %s189_s23 = scalar_lea.vmem [#allocation7], %s469_s7  ;;  %s186_s1 = scalar_lea.sflag [#allocation8], %s800_s6 }
  0x2b   : > { %p828_p3 = pnand %p473_p13, %p212_p2  ;;  %s196_s25 = sshll.u32 %s189_s23, 4  ;;  %s197_s25 = int_to_ptr.vmem [resolvable:$true] %s196_s25 }
  0x2c   : > { %s599_s24 = scalar_lea.vmem %s197_s25, 512  ;;  %s704_s11 = smov [#allocation7]  }
  0x2d   : > { %p600_p5 = scmp.ne.s32.totalorder %s197_s25, %s599_s24  ;;  %s604_s13 = sshll.u32 %s704_s11, 4  ;;  %s605_s13 = int_to_ptr.vmem [resolvable:$false] %s604_s13 }
  0x2e   : > { %s606_s15 = scalar_lea.vmem %s605_s13, 1024  ;;  %p607_p7 = scmp.lt.s32.totalorder %s197_s25, %s605_s13 }
  0x2f   : > { %p602_p6 = pnand %p600_p5, %p560_p1  ;;  %p608_p10 = scmp.lt.s32.totalorder %s606_s15, %s599_s24 }
  0x31   : > { %p603_p4 = pneg %p602_p6  ;;  %p609_p13 = por %p608_p10, %p607_p7 }
  0x33   : > { %p610_p2 = pnand %p609_p13, %p603_p4 }
  0x35   : > { %613 = shalt.err (!%p610_p2)
}
  0x36   : > { %497 = dma.hbm_to_vmem [thread:$0]  (!%p813_p0), %s195_s0, 512, %s197_s25, %s186_s1, %s701_s26, %s702_s27, %s703_s9  }
  0x37   : > { %216 = sbr.rel (%p828_p3) target bundleno = 162 (0xa2), region = 32  ;;  %s849_s6 = sand.u32 (!%p828_p3), 1, %s682_s18  }
  0x38   : > { %s474_s7 = sshll.u32 (!%p828_p3), %s849_s6, 5  ;;  %s219_s8 = scalar_lea.sflag (!%p828_p3), [#allocation5], %s849_s6 }
  0x39   : > { %s222_s12 = scalar_lea.vmem (!%p828_p3), [#allocation4], %s474_s7 }
  0x3c   : > { %665 = dma.done.wait (%p782_p8), %s219_s8, 512  }
  0x3d   : > { %667 = vsyncadd (%p782_p8), %s219_s8, 4294966784  ;;  %s228_s1 = scalar_lea.sflag [#allocation8], %s849_s6  ;;  %s231_s24 = scalar_lea.vmem [#allocation7], %s474_s7 }
  0x3e   : > { %669 = dma.done.wait (%p782_p8), %s228_s1, 512  }
  0x3f   : > { %671 = vsyncadd (%p782_p8), %s228_s1, 4294966784  ;;  %s862_s14 = sld [smem:[#allocation3]]  ;;  %s865_s26 = scalar_lea.vmem [#allocation9], %s849_s6  ;;  %v705_v0 = vmov 0.0   ;;  %v274_v1 = vld [vmem:[%s222_s12] sm:$0xff]  ;;  %v275_v2 = vld [vmem:[%s222_s12 + $0x8] sm:$0xff] }
  0x40   : > { %273 = vst [vmem:[%s865_s26] sm:$0x1] %v705_v0  ;;  %s483_s27 = sshll.u32 %s690_s20, 7  ;;  %v276_v3 = vld [vmem:[%s222_s12 + $0x10] sm:$0xff]  ;;  %v277_v4 = vld [vmem:[%s222_s12 + $0x18] sm:$0xff]  ;;  %v278_v5 = vld [vmem:[%s231_s24] sm:$0xff]  ;;  %p265_p8 = scmp.lt.s32.totalorder %s690_s20, 1 }
  0x41   : > { %s871_s9 = sadd.s32 128, %s483_s27  ;;  %v279_v6 = vld [vmem:[%s231_s24 + $0x8] sm:$0xff]  ;;  %v280_v7 = vld [vmem:[%s231_s24 + $0x10] sm:$0xff]  ;;  %v281_v8 = vld [vmem:[%s231_s24 + $0x18] sm:$0xff]  ;;  %v282_v9 = vsub.f32 %v274_v1, %v278_v5 }
  0x42   : > { %v283_v10 = vsub.f32 %v275_v2, %v279_v6  ;;  %v284_v11 = vsub.f32 %v276_v3, %v280_v7  ;;  %v285_v12 = vsub.f32 %v277_v4, %v281_v8  ;;  %s266_s28 = scalar_select %p265_p8, %s690_s20, 1 }
  0x43   : > { %v286_v13 = vadd.f32 1e-06, %v282_v9 }
  0x44   : > { %v287_v14 = vadd.f32 1e-06, %v283_v10  ;;  %v288_v15 = vadd.f32 1e-06, %v284_v11  ;;  %v289_v16 = vadd.f32 1e-06, %v285_v12  ;;  %s267_s0 = scalar_lea.vmem %s933_s3, %s266_s28 }
  0x45   : > { %v290_v17 = vmul.f32 %v286_v13, %v286_v13  ;;  %v310_v33 = vld [vmem:[%s267_s0] sm:$0x1]  ;;  %p477_p0 = scmp.gt.s32.totalorder %s871_s9, %s862_s14 }
  0x46   : > { %v291_v18 = vmul.f32 %v287_v14, %v287_v14  ;;  %v292_v19 = vmul.f32 %v288_v15, %v288_v15  ;;  %v293_v20 = vmul.f32 %v289_v16, %v289_v16  ;;  %v311_v36 = vsub.f32 1.0, %v310_v33 }
  0x48   : > { %v294_v21 = vadd.f32 %v291_v18, %v290_v17 }
  0x4a   : > { %v295_v22 = vadd.f32 %v294_v21, %v292_v19 }
  0x4c   : > { %v296_v23 = vadd.f32 %v295_v22, %v293_v20 }
  0x4e   : > { %v297_v24 = vrot.slane %v296_v23, 4 }
  0x50   : > { %v298_v25 = vadd.f32 %v297_v24, %v296_v23 }
  0x52   : > { %v299_v26 = vrot.slane %v298_v25, 2 }
  0x54   : > { %v300_v27 = vadd.f32 %v299_v26, %v298_v25 }
  0x56   : > { %v301_v28 = vrot.slane %v300_v27, 1 }
  0x58   : > { %v302_v29 = vadd.f32 %v301_v28, %v300_v27 }
  0x5a   : > { %556 = vrsqrt.f32 %v302_v29  ;;  %vm305_vm0 = vcmp.eq.f32.partialorder %v302_v29, inf  ;;  %v308_v31 = vand.u32 2147483648, %v302_v29  ;;  %vm307_vm1 = vcmp.eq.f32.partialorder %v302_v29, 0.0 }
  0x5b   : > { %v312_v39 = vmul.f32 %v311_v36, %v302_v29 }
  0x67   : > { %v557_v30 = vpop.eup %556 }
  0x68   : > { %v304_v32 = vmul.f32 %v557_v30, %v302_v29 }
  0x6a   : > { %v306_v34 = vsel %vm305_vm0, %v302_v29, %v304_v32 }
  0x6b   : > { %v309_v35 = vsel %vm307_vm1, %v308_v31, %v306_v34 }
  0x6c   : > { %v313_v37 = vsub.f32 2.0, %v309_v35 }
  0x6e   : > { %v314_v38 = vmax.f32 %v313_v37, 0.0 }
  0x70   : > { %v315_v40 = vmul.f32 %v314_v38, %v314_v38  ;;  %326 = sbr.rel (%p477_p0) target bundleno = 121 (0x79), region = 48 }
  0x72   : > { %v316_v41 = vmul.f32 %v315_v40, %v310_v33 }
  0x74   : > { %v317_v42 = vadd.f32 %v316_v41, %v312_v39 }
  0x75   : > { %v327_v43 = vld [vmem:[%s865_s26] sm:$0x1] }
  0x76   : > { %v328_v44 = vadd.f32 %v327_v43, %v317_v42 }
  0x78   : > { %329 = vst [vmem:[%s865_s26] sm:$0x1] %v328_v44 }
  0x79 PF: > { %p478_p1 = scmp.le.s32.totalorder %s871_s9, %s862_s14 }
  0x7b   : > { %332 = sbr.rel (%p478_p1) target bundleno = 139 (0x8b), region = 52 }
  0x80   : > { %v333_v45 = vlaneseq  ;;  %v336_v46 = vstv %s483_s27  ;;  %v339_v48 = vstv %s862_s14  ;;  %v338_v50 = vld [vmem:[%s865_s26] sm:$0x1] }
  0x82   : > { %v334_v47 = vand.u32 127, %v333_v45 }
  0x84   : > { %v337_v49 = vadd.s32 %v336_v46, %v334_v47 }
  0x86   : > { %vm340_vm2 = vcmp.lt.s32.totalorder %v337_v49, %v339_v48 }
  0x87   : > { %v341_v51 = vsel %vm340_vm2, %v317_v42, 0.0 }
  0x88   : > { %v342_v52 = vadd.f32 %v341_v51, %v338_v50 }
  0x8a   : > { %343 = vst [vmem:[%s865_s26] sm:$0x1] %v342_v52 }
  0x8b PF: > { %s480_s23 = sshll.u32 %s690_s20, 4  ;;  %s357_s15 = sshll.u32 %s865_s26, 4  ;;  %s358_s15 = int_to_ptr.vmem [resolvable:$true] %s357_s15 }
  0x8c   : > { %s355_s13 = scalar_lea.hbm %s934_s4, %s480_s23  ;;  %s345_s7 = scalar_lea.sflag [#allocation6], %s849_s6 }
  0x8d   : > { %s614_s8 = scalar_lea.vmem %s358_s15, 16  ;;  %s706_s12 = smov [#allocation9]  }
  0x8e   : > { %p615_p3 = scmp.ne.s32.totalorder %s358_s15, %s614_s8  ;;  %s618_s1 = sshll.u32 %s706_s12, 4  ;;  %s619_s1 = int_to_ptr.vmem [resolvable:$false] %s618_s1 }
  0x8f   : > { %s620_s24 = scalar_lea.vmem %s619_s1, 32  ;;  %p621_p4 = scmp.lt.s32.totalorder %s358_s15, %s619_s1 }
  0x90   : > { %p616_p5 = pnand %p615_p3, %p786_p9  ;;  %p622_p7 = scmp.lt.s32.totalorder %s620_s24, %s614_s8 }
  0x92   : > { %p617_p6 = pneg %p616_p5  ;;  %p623_p10 = por %p622_p7, %p621_p4 }
  0x94   : > { %p624_p13 = pnand %p623_p10, %p617_p6 }
  0x96   : > { %627 = shalt.err (!%p624_p13)
}
  0x97   : > { %s628_s20 = scalar_lea.hbm %s355_s13, 16  ;;  %s632_s26 = scalar_lea.hbm %s934_s4, 32 }
  0x98   : > { %p629_p2 = scmp.ne.s32.totalorder %s355_s13, %s628_s20  ;;  %p633_p1 = scmp.lt.s32.totalorder %s355_s13, %s934_s4 }
  0x99   : > { %p634_p3 = scmp.lt.s32.totalorder %s632_s26, %s628_s20 }
  0x9a   : > { %p630_p8 = pnand %p629_p2, %p786_p9 }
  0x9b   : > { %p635_p5 = por %p634_p3, %p633_p1 }
  0x9c   : > { %p631_p0 = pneg %p630_p8 }
  0x9e   : > { %p636_p12 = pnand %p635_p5, %p631_p0 }
  0xa0   : > { %639 = shalt.err (!%p636_p12)
}
  0xa1   : > { %489 = dma.vmem_to_hbm [thread:$0]  (%p786_p9), %s358_s15, 16, %s355_s13, %s345_s7  }
  0xa2 PF: > { %s369_s28 = sand.u32 1, %s678_s17   ;;  %p945_p6 = scmp.ge.s32.totalorder %s698_s22, 2 }
  0xa3   : > { %s370_s10 = scalar_lea.sflag [#allocation6], %s369_s28 }
  0xa4   : > { %p499_p4 = pnand %p945_p6, %p793_p11 }
  0xa6   : > { %p500_p7 = pneg %p499_p4 }
  0xa8   : > { %673 = dma.done.wait (%p500_p7), %s370_s10, 16  }
  0xa9   : > { %675 = vsyncadd (%p500_p7), %s370_s10, 4294967280  ;;  %s24_s22 = sadd.s32 1, %s698_s22   ;;  %s946_s29 = sld [smem:[#allocation13_spill]] }
  0xaa   : > { %p21_p10 = scmp.ge.s32.totalorder %s24_s22, 4   ;;  %s947_s17 = smov %s682_s18 }
  0xab   : > { %s948_s18 = smov %s686_s19  ;;  %s949_s19 = smov %s791_s30 }
  0xac   : > { %s950_s20 = smov %s694_s21  ;;  %23 = sbr.rel (!%p21_p10) target bundleno = 11 (0xb), region = 105 }
  0xaf   : > { %s951_s21 = smov %s946_s29 }
  0xb1   :  { %374 = vsyncpa [#allocation5], 1 }
  0xb2   :  { %376 = vsyncpa [#allocation5 + $0x1], 1 }
  0xb3   :  { %377 = vsyncpa [#allocation8], 1 }
  0xb4   :  { %379 = vsyncpa [#allocation8 + $0x1], 1 }
  0xb5   :  { %380 = vsyncpa [#allocation6], 1 }
  0xb6   :  { %382 = vsyncpa [#allocation6 + $0x1], 1 }

</bundles_post_ra>
